<compile_context>
chip_gen: v5e
topology: v5e:2x2
jax: 0.10.0
libtpu: 0.0.40
codegen_flags: <defaults>
</compile_context>

<pallas_src>
import functools

import jax
import jax.numpy as jnp
from jax.experimental import pallas as pl
from jax.experimental.pallas import tpu as pltpu


def _round_up(n, m):
    return ((n + m - 1) // m) * m


def _make_kernel(compute_dtype, approx_recip):
    """Fused MLP kernel for one batch tile of `tb` rows.

      h1 = relu(x @ w1 + b1)          # (tb, 128), MXU matmul, f32 accumulation
      h2 = relu(h1 @ w2 + b2)         # (tb, 64)
      dT = w3dT @ h2.T + b3d          # (1, tb)  lane-dense logit difference
      p1 = sigmoid(dT)                # EUP exp (+ approx reciprocal)
      out[0,:] = 1 - p1 ; out[1,:] = p1   # class-major (2, tb) dense store
    """

    def kernel(x_ref, w1_ref, b1_ref, w2_ref, b2_ref, w3dt_ref, b3d_ref, o_ref):
        # Cast the x tile in-register: x stays f32 in HBM (single HBM read,
        # no wrapper-side astype/pad pass).
        x = x_ref[...].astype(compute_dtype)

        # fc1 + ReLU (MXU matmul with f32 accumulation; bias/ReLU in f32 on VPU).
        h1 = jnp.dot(x, w1_ref[...], preferred_element_type=jnp.float32)
        h1 = jnp.maximum(h1 + b1_ref[...], 0.0)

        # fc2 + ReLU.
        h2 = jnp.dot(h1.astype(compute_dtype), w2_ref[...],
                     preferred_element_type=jnp.float32)
        h2 = jnp.maximum(h2 + b2_ref[...], 0.0)

        # fc3 fused with 2-class softmax: softmax([l0, l1])[1] == sigmoid(l1-l0).
        # Transpose h2 once (XLU slot) so the rest of the epilogue is lane-dense.
        h2t = h2.T                                                # (H2, tb) f32
        d = jnp.dot(w3dt_ref[...], h2t,
                    preferred_element_type=jnp.float32) + b3d_ref[...]  # (1, tb)

        e = jnp.exp(-d)                                           # EUP
        if approx_recip:
            p1 = pl.reciprocal(1.0 + e, approx=True)              # EUP, no divide
        else:
            p1 = 1.0 / (1.0 + e)                                  # exact (f32 path)

        # Class-major (2, tb) block: row 0 = P(class 0), row 1 = P(class 1).
        o_ref[0:1, :] = 1.0 - p1
        o_ref[1:2, :] = p1

    return kernel


def _vmem_budget():
    """(vmem_limit_bytes, batch-tile cap) derived from physical VMEM."""
    try:
        phys = int(pltpu.get_tpu_info().vmem_capacity_bytes)
    except Exception:
        phys = 128 * 1024 * 1024
    limit = max(32 * 1024 * 1024, min(96 * 1024 * 1024, (phys * 3) // 4))
    # v7x: 64 MiB physical VMEM per TensorCore -> cap the batch tile at 8192.
    tile_cap = 8192 if phys <= 64 * 1024 * 1024 else 32768
    return limit, tile_cap


@functools.partial(jax.jit, static_argnames=("tile_b", "use_bf16"))
def abuse_classifier_forward(x, params, *, tile_b=8192, use_bf16=True):
    """x: [B, input_dim] float32. params: dict with w1,b1,w2,b2,w3,b3
    (weights stored [in, out], biases [1, out]). Returns [B, 2] softmax probs."""
    B, D = x.shape
    f32 = jnp.float32
    compute_dtype = jnp.bfloat16 if use_bf16 else f32

    vmem_limit, tile_cap = _vmem_budget()
    tile_b = max(256, (min(int(tile_b), tile_cap) // 256) * 256)

    # fc3 + softmax(dim=1) fusion: only the class1-class0 difference is needed.
    # Keep it as a [1, 64] row for the lane-dense epilogue matmul.
    w3dt = (params["w3"][:, 1:2] - params["w3"][:, 0:1]).T.astype(f32)  # (1, H2)
    b3d = (params["b3"][:, 1:2] - params["b3"][:, 0:1]).astype(f32)     # (1, 1)

    w1 = params["w1"].astype(compute_dtype)
    w2 = params["w2"].astype(compute_dtype)
    b1 = params["b1"].astype(f32)
    b2 = params["b2"].astype(f32)
    H1, H2 = w1.shape[1], w2.shape[1]

    # Batch tiling: no full-array padding.  For B >= 256 the tile is a multiple
    # of 256 (MXU M-tile / lane-dense output), the grid uses cdiv, and Pallas
    # masks the partial trailing block (waste < 256 rows).  Tiny batches are
    # padded to 16 rows (bf16 sublane packing) so the block equals the array.
    if B >= 256:
        tb = min(tile_b, (B // 256) * 256)
        x_in, b_eff = x, B
    else:
        b_eff = _round_up(B, 16)
        x_in = jnp.pad(x, ((0, b_eff - B), (0, 0))) if b_eff != B else x
        tb = b_eff

    grid = (pl.cdiv(b_eff, tb),)

    def resident(shape):
        # Full-shape block, constant index -> DMA'd once, stays in VMEM.
        return pl.BlockSpec(shape, lambda i: (0, 0))

    out_t = pl.pallas_call(
        _make_kernel(compute_dtype, approx_recip=use_bf16),
        out_shape=jax.ShapeDtypeStruct((2, b_eff), f32),
        grid=grid,
        in_specs=[
            pl.BlockSpec((tb, D), lambda i: (i, 0)),   # x tile (double-buffered)
            resident((D, H1)),                         # w1
            resident((1, H1)),                         # b1
            resident((H1, H2)),                        # w2
            resident((1, H2)),                         # b2
            resident((1, H2)),                         # w3 difference row
            resident((1, 1)),                          # b3 difference
        ],
        out_specs=pl.BlockSpec((2, tb), lambda i: (0, i)),  # class-major, lane-dense
        compiler_params=pltpu.CompilerParams(
            dimension_semantics=("parallel",),          # megacore split on v7x
            vmem_limit_bytes=vmem_limit),
    )(x_in, w1, b1, w2, b2, w3dt, b3d)

    # Back to the module's (B, 2) row-major layout (tiny 2xB transpose in XLA).
    return out_t[:, :B].T


def init_params(key, input_dim):
    """PyTorch nn.Linear-style init U[-1/sqrt(fan_in), 1/sqrt(fan_in)].
    Weights stored as [in, out]; biases as [1, out]."""
    dims = [(input_dim, 128), (128, 64), (64, 2)]
    params = {}
    for i, (fan_in, fan_out) in enumerate(dims, start=1):
        key, kw, kb = jax.random.split(key, 3)
        bound = 1.0 / jnp.sqrt(jnp.float32(fan_in))
        params[f"w{i}"] = jax.random.uniform(
            kw, (fan_in, fan_out), jnp.float32, minval=-bound, maxval=bound)
        params[f"b{i}"] = jax.random.uniform(
            kb, (1, fan_out), jnp.float32, minval=-bound, maxval=bound)
    return params


def reference_forward(x, params):
    """Pure-f32 reference matching the PyTorch module semantics exactly."""
    h1 = jnp.maximum(x @ params["w1"] + params["b1"], 0.0)
    h2 = jnp.maximum(h1 @ params["w2"] + params["b2"], 0.0)
    logits = h2 @ params["w3"] + params["b3"]
    return jax.nn.softmax(logits, axis=1)


if __name__ == "__main__":
    key = jax.random.PRNGKey(0)
    key, kx1, kx2 = jax.random.split(key, 3)

    input_dim = 32
    params = init_params(key, input_dim)

    # --- Small batch (exercises the tiny-batch / pad-to-16 path) ---
    batch = 8
    x = jax.random.normal(kx1, (batch, input_dim), jnp.float32)
    ref = reference_forward(x, params)

    # Strict check: f32 path (exact divide) vs pure-f32 reference.
    out_f32 = jax.block_until_ready(
        abuse_classifier_forward(x, params, use_bf16=False))
    assert out_f32.shape == (batch, 2)
    assert jnp.allclose(out_f32, ref, atol=1e-5, rtol=1e-5), "f32 mismatch"
    assert jnp.allclose(jnp.sum(out_f32, axis=1), 1.0, atol=1e-4)

    # Default performance path: bf16 matmuls, f32 accumulation, approx recip.
    out_bf16 = jax.block_until_ready(abuse_classifier_forward(x, params))
    assert out_bf16.shape == (batch, 2)
    assert jnp.allclose(out_bf16, ref, atol=2e-2), "bf16 path too far off"
    assert jnp.allclose(jnp.sum(out_bf16, axis=1), 1.0, atol=1e-4)

    # --- Ragged batch (exercises the no-pad partial trailing block path) ---
    batch2 = 333
    x2 = jax.random.normal(kx2, (batch2, input_dim), jnp.float32)
    ref2 = reference_forward(x2, params)
    out2 = jax.block_until_ready(abuse_classifier_forward(x2, params))
    assert out2.shape == (batch2, 2)
    assert jnp.allclose(out2, ref2, atol=2e-2), "ragged bf16 path mismatch"
    assert jnp.allclose(jnp.sum(out2, axis=1), 1.0, atol=1e-4)

    print("KERNEL_OK")
</pallas_src>

<mosaic_0001>
module attributes {stable_mosaic.version = 11 : i64} {
  func.func @kernel(%arg0: i32, %arg1: memref<16x32xf32, #tpu.memory_space<vmem>>, %arg2: memref<32x128xf32, #tpu.memory_space<vmem>>, %arg3: memref<1x128xf32, #tpu.memory_space<vmem>>, %arg4: memref<128x64xf32, #tpu.memory_space<vmem>>, %arg5: memref<1x64xf32, #tpu.memory_space<vmem>>, %arg6: memref<1x64xf32, #tpu.memory_space<vmem>>, %arg7: memref<1x1xf32, #tpu.memory_space<vmem>>, %arg8: memref<2x16xf32, #tpu.memory_space<vmem>>) attributes {dimension_semantics = [#tpu.dimension_semantics<parallel>], iteration_bounds = array<i64: 1>, scalar_prefetch = 0 : i64, scratch_operands = 0 : i64, tpu.core_type = #tpu.core_type<tc>, window_params = [{transform_indices = @transform_0, window_bounds = array<i64: 16, 32>}, {pipeline_mode = #tpu.pipeline_mode<synchronous>, transform_indices = @transform_1, window_bounds = array<i64: 32, 128>}, {pipeline_mode = #tpu.pipeline_mode<synchronous>, transform_indices = @transform_2, window_bounds = array<i64: 1, 128>}, {pipeline_mode = #tpu.pipeline_mode<synchronous>, transform_indices = @transform_3, window_bounds = array<i64: 128, 64>}, {pipeline_mode = #tpu.pipeline_mode<synchronous>, transform_indices = @transform_4, window_bounds = array<i64: 1, 64>}, {pipeline_mode = #tpu.pipeline_mode<synchronous>, transform_indices = @transform_5, window_bounds = array<i64: 1, 64>}, {pipeline_mode = #tpu.pipeline_mode<synchronous>, transform_indices = @transform_6, window_bounds = array<i64: 1, 1>}, {transform_indices = @transform_7, window_bounds = array<i64: 2, 16>}]} {
    %c0 = arith.constant 0 : index
    %c0_0 = arith.constant 0 : index
    %0 = vector.load %arg1[%c0, %c0_0] : memref<16x32xf32, #tpu.memory_space<vmem>>, vector<16x32xf32>
    %c0_1 = arith.constant 0 : index
    %c0_2 = arith.constant 0 : index
    %1 = vector.load %arg2[%c0_1, %c0_2] : memref<32x128xf32, #tpu.memory_space<vmem>>, vector<32x128xf32>
    %cst = arith.constant dense<0.000000e+00> : vector<16x128xf32>
    %2 = tpu.matmul %0, %1, %cst {dimension_numbers = #tpu.dot_dimension_numbers<[1], [0], [0], [1], [0, 0, 1, 1], [], []>} : vector<16x32xf32>, vector<32x128xf32>, vector<16x128xf32> -> vector<16x128xf32>
    %c0_3 = arith.constant 0 : index
    %c0_4 = arith.constant 0 : index
    %3 = vector.load %arg3[%c0_3, %c0_4] : memref<1x128xf32, #tpu.memory_space<vmem>>, vector<1x128xf32>
    %4 = vector.broadcast %3 : vector<1x128xf32> to vector<16x128xf32>
    %5 = arith.addf %2, %4 : vector<16x128xf32>
    %cst_5 = arith.constant 0.000000e+00 : f32
    %6 = vector.broadcast %cst_5 : f32 to vector<16x128xf32>
    %7 = arith.maximumf %5, %6 : vector<16x128xf32>
    %c0_6 = arith.constant 0 : index
    %c0_7 = arith.constant 0 : index
    %8 = vector.load %arg4[%c0_6, %c0_7] : memref<128x64xf32, #tpu.memory_space<vmem>>, vector<128x64xf32>
    %cst_8 = arith.constant dense<0.000000e+00> : vector<16x64xf32>
    %9 = tpu.matmul %7, %8, %cst_8 {dimension_numbers = #tpu.dot_dimension_numbers<[1], [0], [0], [1], [0, 0, 1, 1], [], []>} : vector<16x128xf32>, vector<128x64xf32>, vector<16x64xf32> -> vector<16x64xf32>
    %c0_9 = arith.constant 0 : index
    %c0_10 = arith.constant 0 : index
    %10 = vector.load %arg5[%c0_9, %c0_10] : memref<1x64xf32, #tpu.memory_space<vmem>>, vector<1x64xf32>
    %11 = vector.broadcast %10 : vector<1x64xf32> to vector<16x64xf32>
    %12 = arith.addf %9, %11 : vector<16x64xf32>
    %cst_11 = arith.constant 0.000000e+00 : f32
    %13 = vector.broadcast %cst_11 : f32 to vector<16x64xf32>
    %14 = arith.maximumf %12, %13 : vector<16x64xf32>
    %15 = tpu.transpose %14, [1, 0] : vector<16x64xf32> -> vector<64x16xf32>
    %c0_12 = arith.constant 0 : index
    %c0_13 = arith.constant 0 : index
    %16 = vector.load %arg6[%c0_12, %c0_13] : memref<1x64xf32, #tpu.memory_space<vmem>>, vector<1x64xf32>
    %cst_14 = arith.constant dense<0.000000e+00> : vector<1x16xf32>
    %17 = tpu.matmul %16, %15, %cst_14 {dimension_numbers = #tpu.dot_dimension_numbers<[1], [0], [0], [1], [0, 0, 1, 1], [], []>} : vector<1x64xf32>, vector<64x16xf32>, vector<1x16xf32> -> vector<1x16xf32>
    %c0_15 = arith.constant 0 : index
    %c0_16 = arith.constant 0 : index
    %18 = vector.load %arg7[%c0_15, %c0_16] : memref<1x1xf32, #tpu.memory_space<vmem>>, vector<1x1xf32>
    %19 = vector.broadcast %18 : vector<1x1xf32> to vector<1x16xf32>
    %20 = arith.addf %17, %19 : vector<1x16xf32>
    %cst_17 = arith.constant 0.000000e+00 : f32
    %21 = vector.broadcast %cst_17 : f32 to vector<1x16xf32>
    %22 = arith.subf %21, %20 : vector<1x16xf32>
    %23 = math.exp %22 : vector<1x16xf32>
    %cst_18 = arith.constant 1.000000e+00 : f32
    %24 = vector.broadcast %cst_18 : f32 to vector<1x16xf32>
    %25 = arith.addf %24, %23 : vector<1x16xf32>
    %cst_19 = arith.constant 1.000000e+00 : f32
    %26 = vector.broadcast %cst_19 : f32 to vector<1x16xf32>
    %27 = arith.divf %26, %25 : vector<1x16xf32>
    %cst_20 = arith.constant 1.000000e+00 : f32
    %28 = vector.broadcast %cst_20 : f32 to vector<1x16xf32>
    %29 = arith.subf %28, %27 : vector<1x16xf32>
    %c0_21 = arith.constant 0 : index
    %c0_22 = arith.constant 0 : index
    %30 = vector.load %arg8[%c0_21, %c0_22] : memref<2x16xf32, #tpu.memory_space<vmem>>, vector<1x16xf32>
    tpu.vector_store %arg8[%c0_21, %c0_22], %29 {strides = array<i32>} : memref<2x16xf32, #tpu.memory_space<vmem>>, vector<1x16xf32>,
    %c1 = arith.constant 1 : index
    %c0_23 = arith.constant 0 : index
    %31 = vector.load %arg8[%c1, %c0_23] : memref<2x16xf32, #tpu.memory_space<vmem>>, vector<1x16xf32>
    tpu.vector_store %arg8[%c1, %c0_23], %27 {strides = array<i32>} : memref<2x16xf32, #tpu.memory_space<vmem>>, vector<1x16xf32>,
    return
  }
  func.func @transform_0(%arg0: i32) -> (i32, i32) {
    %c0_i32 = arith.constant 0 : i32
    %c0_i32_0 = arith.constant 0 : i32
    return %arg0, %c0_i32 : i32, i32
  }
  func.func @transform_1(%arg0: i32) -> (i32, i32) {
    %c0_i32 = arith.constant 0 : i32
    %c0_i32_0 = arith.constant 0 : i32
    %c0_i32_1 = arith.constant 0 : i32
    return %c0_i32, %c0_i32_0 : i32, i32
  }
  func.func @transform_2(%arg0: i32) -> (i32, i32) {
    %c0_i32 = arith.constant 0 : i32
    %c0_i32_0 = arith.constant 0 : i32
    %c0_i32_1 = arith.constant 0 : i32
    return %c0_i32, %c0_i32_0 : i32, i32
  }
  func.func @transform_3(%arg0: i32) -> (i32, i32) {
    %c0_i32 = arith.constant 0 : i32
    %c0_i32_0 = arith.constant 0 : i32
    %c0_i32_1 = arith.constant 0 : i32
    return %c0_i32, %c0_i32_0 : i32, i32
  }
  func.func @transform_4(%arg0: i32) -> (i32, i32) {
    %c0_i32 = arith.constant 0 : i32
    %c0_i32_0 = arith.constant 0 : i32
    %c0_i32_1 = arith.constant 0 : i32
    return %c0_i32, %c0_i32_0 : i32, i32
  }
  func.func @transform_5(%arg0: i32) -> (i32, i32) {
    %c0_i32 = arith.constant 0 : i32
    %c0_i32_0 = arith.constant 0 : i32
    %c0_i32_1 = arith.constant 0 : i32
    return %c0_i32, %c0_i32_0 : i32, i32
  }
  func.func @transform_6(%arg0: i32) -> (i32, i32) {
    %c0_i32 = arith.constant 0 : i32
    %c0_i32_0 = arith.constant 0 : i32
    %c0_i32_1 = arith.constant 0 : i32
    return %c0_i32, %c0_i32_0 : i32, i32
  }
  func.func @transform_7(%arg0: i32) -> (i32, i32) {
    %c0_i32 = arith.constant 0 : i32
    %c0_i32_0 = arith.constant 0 : i32
    return %c0_i32, %arg0 : i32, i32
  }
}

</mosaic_0001>

<bundles_post_ra>
// kernel: abuse_classifier_forward.1
= control target key start
LH: loop header
LB: loop body
LE: loop exit
PB: predicated region body
PF: predicated region fallthrough
CT: control target
= control target key end

     0   :  { %vm38_vm0 = vcmask 261120   ;;  %v209_v30 = vmov 0   ;;  %vm123_vm1 = vcmask 523264   ;;  %vm173_vm5 = vcmask 122880   ;;  %s336_s1 = inlined_call_operand.vmem [shape: f32[32,128], index: 1, kind: input, shape index: {}]   ;;  %s337_s3 = inlined_call_operand.vmem [shape: f32[128,64], index: 3, kind: input, shape index: {}]   ;;  %s338_s0 = inlined_call_operand.vmem [shape: f32[16,32], index: 0, kind: input, shape index: {}]   ;;  %s339_s2 = inlined_call_operand.vmem [shape: f32[1,128], index: 2, kind: input, shape index: {}]   ;;  %s340_s4 = inlined_call_operand.vmem [shape: f32[1,64], index: 4, kind: input, shape index: {}]   ;;  %s341_s6 = inlined_call_operand.<no memory space> [shape: f32[1,1], index: 6, kind: input, shape index: {}]   ;;  %s342_s5 = inlined_call_operand.vmem [shape: f32[1,64], index: 5, kind: input, shape index: {}]   ;;  %s343_s7 = inlined_call_operand.vmem [shape: f32[2,16], index: 7, kind: output, shape index: {}]  }
   0x1   :  { %v33_v0 = vld [vmem:[%s336_s1 + $0x18] sm:$0xff]  ;;  %v32_v1 = vld [vmem:[%s336_s1 + $0x10] sm:$0xff]  ;;  %v31_v2 = vld [vmem:[%s336_s1 + $0x8] sm:$0xff]  ;;  %v12_v29 = vstv %s341_s6  ;;  %202 = vset.pattern.permute.xlu0 %v209_v30 }
   0x2   :  { %57 = vmatpush.msra.mxu0 %v33_v0  ;;  %v85_v3 = vld [vmem:[%s337_s3 + $0x78] sm:$0xff]  ;;  %v84_v4 = vld [vmem:[%s337_s3 + $0x70] sm:$0xff]  ;;  %v30_v5 = vld [vmem:[%s336_s1] sm:$0xff]  ;;  %13 = vst [vmem:[#allocation2] sm:$0x1] %v12_v29 }
   0x3   :  { %90 = vmatpush.msra.mxu1 %v85_v3  ;;  %v83_v6 = vld [vmem:[%s337_s3 + $0x68] sm:$0xff]  ;;  %185 = vmatpush.msra.mxu3 %v85_v3  ;;  %v28_v7 = vld [vmem:[%s338_s0] sm:$0xff]  ;;  %v81_v9 = vld [vmem:[%s337_s3 + $0x58] sm:$0xff] }
   0x4   :  { %58 = vmatpush.msra.mxu0 %v32_v1  ;;  %v82_v8 = vld [vmem:[%s337_s3 + $0x60] sm:$0xff]  ;;  %v80_v10 = vld [vmem:[%s337_s3 + $0x50] sm:$0xff]  ;;  %v79_v11 = vld [vmem:[%s337_s3 + $0x48] sm:$0xff] }
   0x5   :  { %91 = vmatpush.msra.mxu1 %v84_v4  ;;  %186 = vmatpush.msra.mxu3 %v84_v4  ;;  %v29_v12 = vld [vmem:[%s338_s0 + $0x8] sm:$0xff]  ;;  %v78_v13 = vld [vmem:[%s337_s3 + $0x40] sm:$0xff]  ;;  %v77_v14 = vld [vmem:[%s337_s3 + $0x38] sm:$0xff] }
   0x6   :  { %59 = vmatpush.msra.mxu0 %v31_v2  ;;  %v76_v15 = vld [vmem:[%s337_s3 + $0x30] sm:$0xff]  ;;  %v75_v16 = vld [vmem:[%s337_s3 + $0x28] sm:$0xff]  ;;  %v74_v17 = vld [vmem:[%s337_s3 + $0x20] sm:$0xff] }
   0x7   :  { %92 = vmatpush.msra.mxu1 %v83_v6  ;;  %187 = vmatpush.msra.mxu3 %v83_v6  ;;  %v73_v18 = vld [vmem:[%s337_s3 + $0x18] sm:$0xff]  ;;  %v72_v19 = vld [vmem:[%s337_s3 + $0x10] sm:$0xff]  ;;  %v71_v20 = vld [vmem:[%s337_s3 + $0x8] sm:$0xff] }
   0x8   :  { %60 = vmatpush.msra.mxu0 %v30_v5  ;;  %v70_v21 = vld [vmem:[%s337_s3] sm:$0xff] }
   0x9   :  { %180 = vmatmul.msk.f32.vlgmr.msra.gmra.mxu0 %vm38_vm0, %v28_v7  ;;  %93 = vmatpush.msra.mxu1 %v82_v8  ;;  %v203_v22 = vld [vmem:[%s339_s2] ss:$0 sm:$0xff] }
   0xa   :  { %188 = vmatpush.msra.mxu3 %v82_v8  ;;  %v116_v31 = vld [vmem:[#allocation2] sm:$0x1] }
   0xb   :  { %94 = vmatpush.msra.mxu1 %v81_v9  ;;  %119 = vperm.xlu0 %202, %v116_v31   ;;  %v204_v32 = vld [vmem:[%s340_s4] ss:$0 sm:$0xff] }
   0xc   :  { %189 = vmatpush.msra.mxu3 %v81_v9  ;;  %v115_v39 = vld [vmem:[%s342_s5] sm:$0x1] }
   0xd   :  { %95 = vmatpush.msra.mxu1 %v80_v10 }
   0xe   :  { %190 = vmatpush.msra.mxu3 %v80_v10 }
   0xf   :  { %96 = vmatpush.msra.mxu1 %v79_v11 }
  0x10   :  { %191 = vmatpush.msra.mxu3 %v79_v11 }
  0x11   :  { %181 = vmatmul.msk.f32.gmra.mxu0 %vm38_vm0, %v29_v12  ;;  %97 = vmatpush.msra.mxu1 %v78_v13 }
  0x12   :  { %192 = vmatpush.msra.mxu3 %v78_v13 }
  0x13   :  { %98 = vmatpush.msra.mxu1 %v77_v14 }
  0x14   :  { %193 = vmatpush.msra.mxu3 %v77_v14 }
  0x15   :  { %99 = vmatpush.msra.mxu1 %v76_v15 }
  0x16   :  { %194 = vmatpush.msra.mxu3 %v76_v15 }
  0x17   :  { %100 = vmatpush.msra.mxu1 %v75_v16 }
  0x18   :  { %195 = vmatpush.msra.mxu3 %v75_v16 }
  0x19   :  { %101 = vmatpush.msra.mxu1 %v74_v17 }
  0x1a   :  { %196 = vmatpush.msra.mxu3 %v74_v17 }
  0x1b   :  { %102 = vmatpush.msra.mxu1 %v73_v18 }
  0x1c   :  { %197 = vmatpush.msra.mxu3 %v73_v18 }
  0x1d   :  { %103 = vmatpush.msra.mxu1 %v72_v19 }
  0x1e   :  { %198 = vmatpush.msra.mxu3 %v72_v19 }
  0x1f   :  { %104 = vmatpush.msra.mxu1 %v71_v20 }
  0x20   :  { %199 = vmatpush.msra.mxu3 %v71_v20 }
  0x21   :  { %105 = vmatpush.msra.mxu1 %v70_v21 }
  0x22   :  { %200 = vmatpush.msra.mxu3 %v70_v21 }
  0x7d   :  { %v120_v40 = vpop.permute.xlu0 %119 }
  0x7e   :  { %v122_v41 = vperm.slane %v120_v40, 0 }
  0x86   :  { %v62_v23 = vpop.f32.mrf.mxu0 }
  0x87   :  { %v63_v24 = vadd.f32 %v203_v22, %v62_v23 }
  0x89   :  { %v68_v25 = vmax.f32 %v63_v24, 0.0 }
  0x8b   :  { %106 = vmatmul.f32.vlgmr.msra.gmra.mxu1 %v68_v25 }
  0x8e   :  { %v65_v26 = vpop.f32.mrf.mxu0 }
  0x8f   :  { %v66_v27 = vadd.f32 %v203_v22, %v65_v26 }
  0x91   :  { %v69_v28 = vmax.f32 %v66_v27, 0.0 }
  0x93   :  { %109 = vmatmul.f32.vlgmr.msra.gmra.mxu3 %v69_v28 }
 0x108   :  { %v107_v33 = vpop.f32.mrf.mxu1 }
 0x109   :  { %v108_v36 = vadd.f32 %v204_v32, %v107_v33 }
 0x10b   :  { %v113_v38 = vmax.f32 %v108_v36, 0.0 }
 0x116   :  { %v110_v34 = vpop.f32.mrf.mxu3 }
 0x117   :  { %v111_v35 = vadd.f32 %v204_v32, %v110_v34 }
 0x119   :  { %v114_v37 = vmax.f32 %v111_v35, 0.0 }
 0x11b   :  { %182 = vmatpush.xpose.msk.msra.mxu2 %vm123_vm1, %v114_v37 }
 0x11f   :  { %183 = vmatpush.xpose.msk.msra.mxu2 %vm123_vm1, %v113_v38 }
 0x122   :  { %184 = vmatmul.msk.f32.vlgmr.msra.gmra.mxu2 %vm123_vm1, %v115_v39 }
 0x1a5   :  { %v150_v42 = vpop.f32.mrf.mxu2 }
 0x1a6   :  { %v151_v43 = vadd.f32 %v150_v42, %v122_v41 }
 0x1a8   :  { %v153_v44 = vsub.f32 0.0, %v151_v43 }
 0x1aa   :  { %v154_v45 = vmul.f32 1.442695, %v153_v44 }
 0x1ac   :  { %205 = vpow2.f32 %v154_v45 }
 0x1b2   :  { %v206_v46 = vpop.eup %205 }
 0x1b3   :  { %v156_v47 = vadd.f32 1.0, %v206_v46 }
 0x1b5   :  { %207 = vrcp.f32 %v156_v47  ;;  %v168_v51 = vand.u32 2147483648, %v156_v47  ;;  %v166_v53 = vand.u32 2147483647, %v156_v47  ;;  %vm162_vm3 = vweird.f32 %v156_v47 }
 0x1b7   :  { %v169_v55 = vor.u32 1.1754944e-38, %v168_v51  ;;  %vm167_vm6 = vcmp.eq.f32.partialorder %v166_v53, 8.507059e+37 }
 0x1bb   :  { %v208_v48 = vpop.eup %207 }
 0x1bc   :  { %v158_v49 = vmul.f32 %v208_v48, %v156_v47  ;;  %vm163_vm2 = vweird.f32 %v208_v48 }
 0x1bd   :  { %vm164_vm4 = vmor %vm162_vm3, %vm163_vm2 }
 0x1be   :  { %v159_v50 = vsub.f32 1.0, %v158_v49 }
 0x1c0   :  { %v160_v52 = vmul.f32 %v208_v48, %v159_v50 }
 0x1c2   :  { %v161_v54 = vadd.f32 %v208_v48, %v160_v52 }
 0x1c4   :  { %v165_v56 = vsel %vm164_vm4, %v208_v48, %v161_v54 }
 0x1c5   :  { %v170_v57 = vsel %vm167_vm6, %v169_v55, %v165_v56 }
 0x1c6   :  { %v172_v58 = vsub.f32 1.0, %v170_v57  ;;  %175 = vst.msk [vmem:[%s343_s7 + $0x1] sm:$0x1] %vm173_vm5, %v170_v57 }
 0x1c8   :  { %174 = vst.msk [vmem:[%s343_s7] sm:$0x1] %vm173_vm5, %v172_v58 }

</bundles_post_ra>
